<compile_context>
chip_gen: v7x
topology: tpu7x:2x2x1
jax: 0.10.0
libtpu: 0.0.40
codegen_flags: <defaults>
</compile_context>

<pallas_src>
import jax
import jax.numpy as jnp
from jax.experimental import pallas as pl
from jax.experimental.pallas import tpu as pltpu

LEAKY_SLOPE = 0.01   # torch.nn.LeakyReLU default negative_slope
LN_EPS = 1e-5        # torch.nn.LayerNorm default eps

TARGET_BLOCK_BYTES = 2 * 1024 * 1024   # ~1-4 MiB blocks reach ~85% of HBM roofline
MAX_BLOCK_BYTES = 4 * 1024 * 1024      # x2 for double buffering -> <= 8 MiB, safe everywhere


def _num_tensorcores():
    """Only v7x has 2 TensorCores per chip; v5e/v6e have 1."""
    try:
        kind = jax.devices()[0].device_kind.lower()
    except Exception:
        return 1
    return 2 if "v7" in kind else 1


def _pick_tiles(B, C, HW, itemsize):
    """Byte-targeted tiling for the flattened (B*C, HW) input.

    tb (images per batch tile): divisor of B with tb % 8 == 0 or tb == B, so
       both the x block (tb*C, thw) and the (tb, emb_dim) output block satisfy
       the (8, 128) block-shape rule; sized so the x block lands near
       TARGET_BLOCK_BYTES instead of a hard image-count cap.
    thw (spatial tile): multiple of 128 dividing HW, used only when a single
       image's rows would blow the per-block byte cap (large images).
    On v7x keep >= 2 batch grid steps when possible so the "parallel" axis
    shards across the 2 TensorCores; don't split on v5e/v6e.
    """
    num_cores = _num_tensorcores()
    valid_tbs = [d for d in range(1, B + 1)
                 if B % d == 0 and (d % 8 == 0 or d == B)]
    tb_min = min(valid_tbs)

    row_bytes = HW * itemsize
    if tb_min * C * row_bytes <= MAX_BLOCK_BYTES or HW % 128 != 0:
        # Whole spatial extent per block (or HW not 128-tileable).
        # TODO(synk): HW that is not a multiple of 128 with a very large C*HW
        # image stays a single spatial block (edge-masked HW tiling not done).
        thw = HW
    else:
        best = 128
        t = 128
        while t <= HW:
            if HW % t == 0 and tb_min * C * t * itemsize <= MAX_BLOCK_BYTES:
                best = t
            t += 128
        thw = best

    per_image_block = C * thw * itemsize
    target_tb = max(1, TARGET_BLOCK_BYTES // max(1, per_image_block))
    if num_cores > 1 and B >= num_cores:
        # v7x: leave at least num_cores batch steps for megacore sharding.
        target_tb = max(1, min(target_tb, B // num_cores))

    candidates = [d for d in valid_tbs
                  if d <= target_tb and d * per_image_block <= MAX_BLOCK_BYTES]
    if candidates:
        tb = max(candidates)
    else:
        fitting = [d for d in valid_tbs if d * per_image_block <= MAX_BLOCK_BYTES]
        tb = min(fitting) if fitting else tb_min
    return tb, thw


def _make_kernel(tb, C, inv_hw):
    def kernel(x_ref, wconv_ref, bconv_ref, gamma_ref, beta_ref, wlin_ref,
               o_ref, acc_ref):
        hw = pl.program_id(1)

        @pl.when(hw == 0)
        def _():
            acc_ref[...] = jnp.zeros_like(acc_ref)

        # x block: (tb*C, thw), spatial on lanes -> lane-dense XLU reduce.
        x = x_ref[...].astype(jnp.float32)
        acc_ref[...] += jnp.sum(x, axis=-1, keepdims=True)        # (tb*C, 1)

        @pl.when(hw == pl.num_programs(1) - 1)
        def _():
            # ---- avg-pool (commuted ahead of the linear 1x1 conv) ----
            pooled = acc_ref[...].reshape(tb, C) * inv_hw          # (tb, C)

            # ---- 1x1 conv on pooled features: (tb, C) @ (C, E) + bias ----
            h = jnp.dot(pooled, wconv_ref[...],
                        preferred_element_type=jnp.float32) + bconv_ref[...]

            # ---- LeakyReLU (negative_slope = 0.01) ----
            act = jnp.where(h > 0, h, LEAKY_SLOPE * h)

            # ---- LayerNorm over the channel dim E ----
            mu = jnp.mean(act, axis=-1, keepdims=True)
            var = jnp.mean((act - mu) ** 2, axis=-1, keepdims=True)
            normed = (act - mu) * jax.lax.rsqrt(var + LN_EPS)
            normed = normed * gamma_ref[...] + beta_ref[...]       # (tb, E)

            # ---- Linear(E -> emb_dim), no bias ----
            out = jnp.dot(normed, wlin_ref[...],
                          preferred_element_type=jnp.float32)
            o_ref[...] = out.astype(o_ref.dtype)                   # (tb, emb_dim)

    return kernel


def pooling_decoder(x_nchw, w_conv, b_conv, gamma, beta, w_lin):
    """x_nchw: (B, C, H, W) float32. Returns (B, emb_dim)."""
    B, C, H, W = x_nchw.shape
    HW = H * W
    E = w_conv.shape[1]
    emb_dim = w_lin.shape[1]
    itemsize = jnp.dtype(x_nchw.dtype).itemsize

    tb, thw = _pick_tiles(B, C, HW, itemsize)

    # NCHW consumed directly; batch*channel flattened onto sublanes (dense
    # even when C < 8), spatial on lanes.  Pure reshape, no wrapper transpose.
    x2d = x_nchw.reshape(B * C, HW)

    b_conv2 = b_conv.reshape(1, E)
    gamma2 = gamma.reshape(1, E)
    beta2 = beta.reshape(1, E)

    grid = (B // tb, HW // thw)
    kernel = _make_kernel(tb, C, 1.0 / HW)

    return pl.pallas_call(
        kernel,
        out_shape=jax.ShapeDtypeStruct((B, emb_dim), x_nchw.dtype),
        grid_spec=pltpu.PrefetchScalarGridSpec(
            num_scalar_prefetch=0,
            grid=grid,
            in_specs=[
                pl.BlockSpec((tb * C, thw), lambda b, h: (b, h)),   # x tile
                pl.BlockSpec((C, E), lambda b, h: (0, 0)),          # conv weight
                pl.BlockSpec((1, E), lambda b, h: (0, 0)),          # conv bias
                pl.BlockSpec((1, E), lambda b, h: (0, 0)),          # LN gamma
                pl.BlockSpec((1, E), lambda b, h: (0, 0)),          # LN beta
                pl.BlockSpec((E, emb_dim), lambda b, h: (0, 0)),    # linear weight
            ],
            out_specs=pl.BlockSpec((tb, emb_dim), lambda b, h: (b, 0)),
            scratch_shapes=[pltpu.VMEM((tb * C, 1), jnp.float32)],  # pooled sums
        ),
        compiler_params=pltpu.CompilerParams(
            dimension_semantics=("parallel", "arbitrary")),
    )(x2d, w_conv, b_conv2, gamma2, beta2, w_lin)


def reference(x_nchw, w_conv, b_conv, gamma, beta, w_lin):
    """Pure-JAX reference of the PyTorch forward (conv first, then pool)."""
    B, C, H, W = x_nchw.shape
    x = jnp.transpose(x_nchw, (0, 2, 3, 1)).reshape(B, H * W, C)
    h = jnp.einsum("bpc,ce->bpe", x, w_conv) + b_conv[None, None, :]
    p = jnp.mean(h, axis=1)                                   # (B, E)
    a = jnp.where(p > 0, p, LEAKY_SLOPE * p)
    mu = jnp.mean(a, axis=-1, keepdims=True)
    var = jnp.mean((a - mu) ** 2, axis=-1, keepdims=True)
    n = (a - mu) / jnp.sqrt(var + LN_EPS) * gamma[None, :] + beta[None, :]
    return n @ w_lin                                          # (B, emb_dim)


if __name__ == "__main__":
    # Small, forward-consistent shapes.
    B, C, H, W = 2, 4, 16, 16
    EXPANSION = 32        # Conv2d(in_channels=C, expansion, kernel=1)
    EMB_DIM = 32

    key = jax.random.PRNGKey(0)
    kx, kw1, kb1, kw2 = jax.random.split(key, 4)

    x = jax.random.normal(kx, (B, C, H, W), dtype=jnp.float32)

    # Deterministic parameter init (synthetic, PyTorch-like scales).
    # Conv2d(C, E, 1): weight (E, C, 1, 1) -> stored here as (C, E) for x @ W.
    bound_conv = 1.0 / jnp.sqrt(C)
    w_conv = jax.random.uniform(kw1, (C, EXPANSION), jnp.float32,
                                -bound_conv, bound_conv)
    b_conv = jax.random.uniform(kb1, (EXPANSION,), jnp.float32,
                                -bound_conv, bound_conv)
    # LayerNorm(E): gamma=1, beta=0 (PyTorch default init).
    gamma = jnp.ones((EXPANSION,), jnp.float32)
    beta = jnp.zeros((EXPANSION,), jnp.float32)
    # Linear(E, emb_dim, bias=False), weight scaled by 0.1 as in __init__.
    bound_lin = 1.0 / jnp.sqrt(EXPANSION)
    w_lin = 0.1 * jax.random.uniform(kw2, (EXPANSION, EMB_DIM), jnp.float32,
                                     -bound_lin, bound_lin)
    # NOTE: dropout=0.0 -> torch.nn.Dropout never added; intentionally omitted.

    out = pooling_decoder(x, w_conv, b_conv, gamma, beta, w_lin)
    out = jax.block_until_ready(out)

    ref = reference(x, w_conv, b_conv, gamma, beta, w_lin)
    assert out.shape == (B, EMB_DIM), out.shape
    assert jnp.allclose(out, ref, atol=1e-5, rtol=1e-5), \
        float(jnp.max(jnp.abs(out - ref)))

    print("KERNEL_OK")
</pallas_src>

<mosaic_0001>
module attributes {stable_mosaic.version = 11 : i64} {
  func.func @kernel(%arg0: i32, %arg1: i32, %arg2: memref<8x256xf32, #tpu.memory_space<vmem>>, %arg3: memref<4x32xf32, #tpu.memory_space<vmem>>, %arg4: memref<1x32xf32, #tpu.memory_space<vmem>>, %arg5: memref<1x32xf32, #tpu.memory_space<vmem>>, %arg6: memref<1x32xf32, #tpu.memory_space<vmem>>, %arg7: memref<32x32xf32, #tpu.memory_space<vmem>>, %arg8: memref<2x32xf32, #tpu.memory_space<vmem>>, %arg9: memref<8x1xf32, #tpu.memory_space<vmem>>) attributes {dimension_semantics = [#tpu.dimension_semantics<parallel>, #tpu.dimension_semantics<arbitrary>], iteration_bounds = array<i64: 1, 1>, scalar_prefetch = 0 : i64, scratch_operands = 1 : i64, tpu.core_type = #tpu.core_type<tc>, window_params = [{transform_indices = @transform_0, window_bounds = array<i64: 8, 256>}, {pipeline_mode = #tpu.pipeline_mode<synchronous>, transform_indices = @transform_1, window_bounds = array<i64: 4, 32>}, {pipeline_mode = #tpu.pipeline_mode<synchronous>, transform_indices = @transform_2, window_bounds = array<i64: 1, 32>}, {pipeline_mode = #tpu.pipeline_mode<synchronous>, transform_indices = @transform_3, window_bounds = array<i64: 1, 32>}, {pipeline_mode = #tpu.pipeline_mode<synchronous>, transform_indices = @transform_4, window_bounds = array<i64: 1, 32>}, {pipeline_mode = #tpu.pipeline_mode<synchronous>, transform_indices = @transform_5, window_bounds = array<i64: 32, 32>}, {transform_indices = @transform_6, window_bounds = array<i64: 2, 32>}]} {
    %c0_i32 = arith.constant 0 : i32
    %0 = arith.cmpi eq, %arg1, %c0_i32 : i32
    %1 = arith.extui %0 : i1 to i32
    %c0_i32_0 = arith.constant 0 : i32
    %2 = arith.cmpi ne, %1, %c0_i32_0 : i32
    scf.if %2 {
      %cst_8 = arith.constant 0.000000e+00 : f32
      %12 = vector.broadcast %cst_8 : f32 to vector<8x1xf32>
      %c0_9 = arith.constant 0 : index
      %c0_10 = arith.constant 0 : index
      %13 = vector.load %arg9[%c0_9, %c0_10] : memref<8x1xf32, #tpu.memory_space<vmem>>, vector<8x1xf32>
      tpu.vector_store %arg9[%c0_9, %c0_10], %12 {strides = array<i32>} : memref<8x1xf32, #tpu.memory_space<vmem>>, vector<8x1xf32>,
    } else {
    }
    %c0 = arith.constant 0 : index
    %c0_1 = arith.constant 0 : index
    %3 = vector.load %arg2[%c0, %c0_1] : memref<8x256xf32, #tpu.memory_space<vmem>>, vector<8x256xf32>
    %c0_2 = arith.constant 0 : index
    %c0_3 = arith.constant 0 : index
    %4 = vector.load %arg9[%c0_2, %c0_3] : memref<8x1xf32, #tpu.memory_space<vmem>>, vector<8x1xf32>
    %cst = arith.constant dense<0.000000e+00> : vector<8xf32>
    %5 = vector.multi_reduction <add>, %3, %cst [1] : vector<8x256xf32> to vector<8xf32>
    %6 = vector.shape_cast %5 : vector<8xf32> to vector<8x1xf32>
    %7 = arith.addf %4, %6 : vector<8x1xf32>
    %c0_4 = arith.constant 0 : index
    %c0_5 = arith.constant 0 : index
    %8 = vector.load %arg9[%c0_4, %c0_5] : memref<8x1xf32, #tpu.memory_space<vmem>>, vector<8x1xf32>
    tpu.vector_store %arg9[%c0_4, %c0_5], %7 {strides = array<i32>} : memref<8x1xf32, #tpu.memory_space<vmem>>, vector<8x1xf32>,
    %c0_i32_6 = arith.constant 0 : i32
    %9 = arith.cmpi eq, %arg1, %c0_i32_6 : i32
    %10 = arith.extui %9 : i1 to i32
    %c0_i32_7 = arith.constant 0 : i32
    %11 = arith.cmpi ne, %10, %c0_i32_7 : i32
    scf.if %11 {
      %c0_8 = arith.constant 0 : index
      %c0_9 = arith.constant 0 : index
      %12 = vector.load %arg9[%c0_8, %c0_9] : memref<8x1xf32, #tpu.memory_space<vmem>>, vector<8x1xf32>
      %13 = vector.shape_cast %12 : vector<8x1xf32> to vector<2x4xf32>
      %cst_10 = arith.constant 3.906250e-03 : f32
      %14 = vector.broadcast %cst_10 : f32 to vector<2x4xf32>
      %15 = arith.mulf %13, %14 : vector<2x4xf32>
      %c0_11 = arith.constant 0 : index
      %c0_12 = arith.constant 0 : index
      %16 = vector.load %arg3[%c0_11, %c0_12] : memref<4x32xf32, #tpu.memory_space<vmem>>, vector<4x32xf32>
      %cst_13 = arith.constant dense<0.000000e+00> : vector<2x32xf32>
      %17 = tpu.matmul %15, %16, %cst_13 {dimension_numbers = #tpu.dot_dimension_numbers<[1], [0], [0], [1], [0, 0, 1, 1], [], []>} : vector<2x4xf32>, vector<4x32xf32>, vector<2x32xf32> -> vector<2x32xf32>
      %c0_14 = arith.constant 0 : index
      %c0_15 = arith.constant 0 : index
      %18 = vector.load %arg4[%c0_14, %c0_15] : memref<1x32xf32, #tpu.memory_space<vmem>>, vector<1x32xf32>
      %19 = vector.broadcast %18 : vector<1x32xf32> to vector<2x32xf32>
      %20 = arith.addf %17, %19 : vector<2x32xf32>
      %cst_16 = arith.constant 0.000000e+00 : f32
      %21 = vector.broadcast %cst_16 : f32 to vector<2x32xf32>
      %22 = arith.cmpf ogt, %20, %21 : vector<2x32xf32>
      %cst_17 = arith.constant 0.00999999977 : f32
      %23 = vector.broadcast %cst_17 : f32 to vector<2x32xf32>
      %24 = arith.mulf %23, %20 : vector<2x32xf32>
      %25 = arith.select %22, %20, %24 : vector<2x32xi1>, vector<2x32xf32>
      %cst_18 = arith.constant dense<0.000000e+00> : vector<2xf32>
      %26 = vector.multi_reduction <add>, %25, %cst_18 [1] : vector<2x32xf32> to vector<2xf32>
      %27 = vector.shape_cast %26 : vector<2xf32> to vector<2x1xf32>
      %cst_19 = arith.constant 3.200000e+01 : f32
      %28 = vector.broadcast %cst_19 : f32 to vector<2x1xf32>
      %29 = arith.divf %27, %28 : vector<2x1xf32>
      %30 = vector.broadcast %29 : vector<2x1xf32> to vector<2x32xf32>
      %31 = arith.subf %25, %30 : vector<2x32xf32>
      %32 = arith.mulf %31, %31 : vector<2x32xf32>
      %cst_20 = arith.constant dense<0.000000e+00> : vector<2xf32>
      %33 = vector.multi_reduction <add>, %32, %cst_20 [1] : vector<2x32xf32> to vector<2xf32>
      %34 = vector.shape_cast %33 : vector<2xf32> to vector<2x1xf32>
      %cst_21 = arith.constant 3.200000e+01 : f32
      %35 = vector.broadcast %cst_21 : f32 to vector<2x1xf32>
      %36 = arith.divf %34, %35 : vector<2x1xf32>
      %37 = vector.broadcast %29 : vector<2x1xf32> to vector<2x32xf32>
      %38 = arith.subf %25, %37 : vector<2x32xf32>
      %cst_22 = arith.constant 9.99999974E-6 : f32
      %39 = vector.broadcast %cst_22 : f32 to vector<2x1xf32>
      %40 = arith.addf %36, %39 : vector<2x1xf32>
      %41 = math.rsqrt %40 : vector<2x1xf32>
      %42 = vector.broadcast %41 : vector<2x1xf32> to vector<2x32xf32>
      %43 = arith.mulf %38, %42 : vector<2x32xf32>
      %c0_23 = arith.constant 0 : index
      %c0_24 = arith.constant 0 : index
      %44 = vector.load %arg5[%c0_23, %c0_24] : memref<1x32xf32, #tpu.memory_space<vmem>>, vector<1x32xf32>
      %45 = vector.broadcast %44 : vector<1x32xf32> to vector<2x32xf32>
      %46 = arith.mulf %43, %45 : vector<2x32xf32>
      %c0_25 = arith.constant 0 : index
      %c0_26 = arith.constant 0 : index
      %47 = vector.load %arg6[%c0_25, %c0_26] : memref<1x32xf32, #tpu.memory_space<vmem>>, vector<1x32xf32>
      %48 = vector.broadcast %47 : vector<1x32xf32> to vector<2x32xf32>
      %49 = arith.addf %46, %48 : vector<2x32xf32>
      %c0_27 = arith.constant 0 : index
      %c0_28 = arith.constant 0 : index
      %50 = vector.load %arg7[%c0_27, %c0_28] : memref<32x32xf32, #tpu.memory_space<vmem>>, vector<32x32xf32>
      %cst_29 = arith.constant dense<0.000000e+00> : vector<2x32xf32>
      %51 = tpu.matmul %49, %50, %cst_29 {dimension_numbers = #tpu.dot_dimension_numbers<[1], [0], [0], [1], [0, 0, 1, 1], [], []>} : vector<2x32xf32>, vector<32x32xf32>, vector<2x32xf32> -> vector<2x32xf32>
      %c0_30 = arith.constant 0 : index
      %c0_31 = arith.constant 0 : index
      %52 = vector.load %arg8[%c0_30, %c0_31] : memref<2x32xf32, #tpu.memory_space<vmem>>, vector<2x32xf32>
      tpu.vector_store %arg8[%c0_30, %c0_31], %51 {strides = array<i32>} : memref<2x32xf32, #tpu.memory_space<vmem>>, vector<2x32xf32>,
    } else {
    }
    return
  }
  func.func @transform_0(%arg0: i32, %arg1: i32) -> (i32, i32) {
    %c0_i32 = arith.constant 0 : i32
    return %arg0, %arg1 : i32, i32
  }
  func.func @transform_1(%arg0: i32, %arg1: i32) -> (i32, i32) {
    %c0_i32 = arith.constant 0 : i32
    %c0_i32_0 = arith.constant 0 : i32
    %c0_i32_1 = arith.constant 0 : i32
    return %c0_i32, %c0_i32_0 : i32, i32
  }
  func.func @transform_2(%arg0: i32, %arg1: i32) -> (i32, i32) {
    %c0_i32 = arith.constant 0 : i32
    %c0_i32_0 = arith.constant 0 : i32
    %c0_i32_1 = arith.constant 0 : i32
    return %c0_i32, %c0_i32_0 : i32, i32
  }
  func.func @transform_3(%arg0: i32, %arg1: i32) -> (i32, i32) {
    %c0_i32 = arith.constant 0 : i32
    %c0_i32_0 = arith.constant 0 : i32
    %c0_i32_1 = arith.constant 0 : i32
    return %c0_i32, %c0_i32_0 : i32, i32
  }
  func.func @transform_4(%arg0: i32, %arg1: i32) -> (i32, i32) {
    %c0_i32 = arith.constant 0 : i32
    %c0_i32_0 = arith.constant 0 : i32
    %c0_i32_1 = arith.constant 0 : i32
    return %c0_i32, %c0_i32_0 : i32, i32
  }
  func.func @transform_5(%arg0: i32, %arg1: i32) -> (i32, i32) {
    %c0_i32 = arith.constant 0 : i32
    %c0_i32_0 = arith.constant 0 : i32
    %c0_i32_1 = arith.constant 0 : i32
    return %c0_i32, %c0_i32_0 : i32, i32
  }
  func.func @transform_6(%arg0: i32, %arg1: i32) -> (i32, i32) {
    %c0_i32 = arith.constant 0 : i32
    %c0_i32_0 = arith.constant 0 : i32
    return %arg0, %c0_i32 : i32, i32
  }
}

</mosaic_0001>

<bundles_post_ra>
// kernel: tpu_custom_call.1
= control target key start
LH: loop header
LB: loop body
LE: loop exit
PB: predicated region body
PF: predicated region fallthrough
CT: control target
= control target key end

     0   :  { %11 = vsyncpa [#allocation4], 0  ;;  %s568_s0 = inlined_call_operand.hbm [shape: f32[8,256], index: 0, kind: input, shape index: {}]   ;;  %s569_s1 = inlined_call_operand.hbm [shape: f32[4,32], index: 1, kind: input, shape index: {}]   ;;  %s570_s2 = inlined_call_operand.vmem [shape: f32[1,32], index: 2, kind: input, shape index: {}]   ;;  %s571_s3 = inlined_call_operand.vmem [shape: f32[1,32], index: 3, kind: input, shape index: {}]   ;;  %s572_s4 = inlined_call_operand.vmem [shape: f32[1,32], index: 4, kind: input, shape index: {}]   ;;  %s573_s5 = inlined_call_operand.hbm [shape: f32[32,32], index: 5, kind: input, shape index: {}]   ;;  %s574_s6 = inlined_call_operand.hbm [shape: f32[2,32], index: 6, kind: output, shape index: {}]  }
   0x1   :  { %12 = vsyncpa [#allocation7], 0 }
   0x2   :  { %13 = vsyncpa [#allocation5], 0  ;;  %s463_s21 = smov [#allocation6]   ;;  %s464_s23 = smov [#allocation3]  }
   0x3   :  { %s30_s22 = sshll.u32 %s463_s21, 4  ;;  %s20_s24 = sshll.u32 %s464_s23, 4  ;;  %s31_s22 = int_to_ptr.vmem [resolvable:$true] %s30_s22  ;;  %s21_s24 = int_to_ptr.vmem [resolvable:$true] %s20_s24 }
   0x4   :  { %s369_s27 = scalar_lea.hbm %s569_s1, 64 }
   0x5   :  { %p370_p0 = scmp.ne.s32.totalorder %s569_s1, %s369_s27  ;;  %p373_p1 = scmp.lt.u32.totalorder %s369_s27, %s569_s1 }
   0x7   :  { %p375_p2 = pnand %p373_p1, %p370_p0 }
   0x9   :  { %378 = shalt.err (!%p375_p2)
}
   0xa   :  { %s379_s8 = scalar_lea.vmem %s31_s22, 64  ;;  %p384_p4 = scmp.lt.s32.totalorder %s31_s22, %s31_s22 }
   0xb   :  { %p380_p3 = scmp.ne.s32.totalorder %s31_s22, %s379_s8  ;;  %p385_p5 = scmp.lt.s32.totalorder %s379_s8, %s379_s8 }
   0xd   :  { %p386_p6 = por %p385_p5, %p384_p4 }
   0xf   :  { %p387_p7 = pnand %p386_p6, %p380_p3 }
  0x11   :  { %390 = shalt.err (!%p387_p7)
}
  0x12   :  { %33 = dma.hbm_to_vmem [thread:$0]  %s569_s1, 64, %s31_s22, [#allocation7]  }
  0x13   :  { %s391_s13 = scalar_lea.hbm %s568_s0, 256 }
  0x14   :  { %p392_p8 = scmp.ne.s32.totalorder %s568_s0, %s391_s13  ;;  %p395_p9 = scmp.lt.u32.totalorder %s391_s13, %s568_s0 }
  0x16   :  { %p397_p10 = pnand %p395_p9, %p392_p8 }
  0x18   :  { %400 = shalt.err (!%p397_p10)
}
  0x19   :  { %s401_s18 = scalar_lea.vmem %s21_s24, 256  ;;  %p406_p12 = scmp.lt.s32.totalorder %s21_s24, %s21_s24 }
  0x1a   :  { %p402_p11 = scmp.ne.s32.totalorder %s21_s24, %s401_s18  ;;  %p407_p13 = scmp.lt.s32.totalorder %s401_s18, %s401_s18 }
  0x1c   :  { %p408_p0 = por %p407_p13, %p406_p12 }
  0x1e   :  { %p409_p1 = pnand %p408_p0, %p402_p11 }
  0x20   :  { %412 = shalt.err (!%p409_p1)
}
  0x21   :  { %23 = dma.hbm_to_vmem [thread:$0]  %s568_s0, 256, %s21_s24, [#allocation4]  }
  0x22   :  { %s465_s20 = smov [#allocation8]   ;;  %s413_s25 = scalar_lea.hbm %s573_s5, 512 }
  0x23   :  { %s45_s21 = sshll.u32 %s465_s20, 4  ;;  %p414_p2 = scmp.ne.s32.totalorder %s573_s5, %s413_s25  ;;  %s46_s21 = int_to_ptr.vmem [resolvable:$true] %s45_s21 }
  0x24   :  { %p417_p3 = scmp.lt.u32.totalorder %s413_s25, %s573_s5 }
  0x26   :  { %p419_p4 = pnand %p417_p3, %p414_p2 }
  0x28   :  { %422 = shalt.err (!%p419_p4)
}
  0x29   :  { %s423_s30 = scalar_lea.vmem %s46_s21, 512  ;;  %p428_p6 = scmp.lt.s32.totalorder %s46_s21, %s46_s21 }
  0x2a   :  { %p424_p5 = scmp.ne.s32.totalorder %s46_s21, %s423_s30  ;;  %p429_p7 = scmp.lt.s32.totalorder %s423_s30, %s423_s30 }
  0x2c   :  { %p430_p8 = por %p429_p7, %p428_p6 }
  0x2e   :  { %p431_p9 = pnand %p430_p8, %p424_p5 }
  0x30   :  { %434 = shalt.err (!%p431_p9)
}
  0x31   :  { %s466_s0 = smov 128   ;;  %s467_s24 = smov 8  }
  0x32   :  { %51 = dma.hbm_to_vmem [thread:$0]  %s573_s5, 512, %s46_s21, [#allocation7], %s466_s0, %s466_s0, %s467_s24  }
  0x33   :  { %457 = dma.done.wait [#allocation4], 256  }
  0x34   :  { %458 = vsyncadd [#allocation4], 4294967040 }
  0x35   :  { %459 = dma.done.wait [#allocation7], 576  }
  0x36   :  { %460 = vsyncadd [#allocation7], 4294966720  ;;  %vm65_vm0 = vcmask 7168   ;;  %v468_v0 = vmov 0.0   ;;  %v67_v1 = vld [vmem:[#allocation3] sm:$0xff]  ;;  %v68_v2 = vld [vmem:[#allocation3 + $0x8] sm:$0xff]  ;;  %v101_v13 = vlaneseq }
  0x37   :  { %66 = vst.msk [vmem:[#allocation2] sm:$0xff] %vm65_vm0, %v468_v0  ;;  %332 = vmatprep.subr.mxu0 %v468_v0  ;;  %v70_v3 = vadd.f32 %v68_v2, %v67_v1  ;;  %v469_v4 = vmov 0   ;;  %v85_v12 = vld [vmem:[#allocation6] sm:$0xf]  ;;  %vm116_vm1 = vcmask 1043456   ;;  %vm470_vm2 = vmmov 0  }
  0x38   :  { %364 = vset.pattern.permute.xlu0 %v469_v4  ;;  %365 = vset.pattern.permute.xlu1 %v469_v4  ;;  %v102_v14 = vand.u32 127, %v101_v13  ;;  %v104_v15 = vshrl.u32 %v101_v13, 7  ;;  %vm111_vm3 = vcmask 1041409   ;;  %vm113_vm4 = vcmask 31744   ;;  %v319_v22 = vld [vmem:[%s570_s2] ss:$0 sm:$0xff] }
  0x39   :  { %71 = vadd.xlane.f32.xlu0 %v70_v3  ;;  %333 = vmatpush3.msk.msra.mxu0 %vm116_vm1, %v85_v12  ;;  %vm193_vm6 = vcmask 254976   ;;  %v224_v34 = vld [vmem:[#allocation8] sm:$0xff]  ;;  %v225_v35 = vld [vmem:[#allocation8 + $0x8] sm:$0xff]  ;;  %v226_v36 = vld [vmem:[#allocation8 + $0x10] sm:$0xff]  ;;  %v471_v37 = vmov 0.0|0.0   ;;  %vm228_vm7 = vcmask 261120  }
  0x3a   :  { %334 = vmatprep.mubr.msk.f32.mxu0 %vm470_vm2, %v468_v0  ;;  %345 = vmatprep.mubr.msk.f32.mxu1 %vm470_vm2, %v468_v0  ;;  %v105_v16 = vsub.s32 %v102_v14, %v104_v15  ;;  %v349_v38 = vpack.c.bf16 %v225_v35, %v224_v34  ;;  %v227_v39 = vld [vmem:[#allocation8 + $0x18] sm:$0xff]  ;;  %v322_v45 = vld [vmem:[%s571_s3] ss:$0 sm:$0xff]  ;;  %s472_s13 = smov [#allocation9]  }
  0x3b   :  { %348 = vmatprep.subr.bf16.mxu1 %v471_v37  ;;  %v352_v40 = vpack.c.bf16 %v227_v39, %v226_v36  ;;  %v323_v47 = vld [vmem:[%s572_s4] ss:$0 sm:$0xff]  ;;  %s309_s14 = sshll.u32 %s472_s13, 4  ;;  %s310_s14 = int_to_ptr.vmem [resolvable:$true] %s309_s14 }
  0x3c   :  { %350 = vmatpush3.bf16.msra.mxu1 %v349_v38  ;;  %s435_s15 = scalar_lea.vmem %s310_s14, 32  ;;  %p440_p11 = scmp.lt.s32.totalorder %s310_s14, %s310_s14 }
  0x3d   :  { %351 = vmatprep.subr.bf16.mxu1 %v471_v37  ;;  %p436_p10 = scmp.ne.s32.totalorder %s310_s14, %s435_s15  ;;  %p441_p12 = scmp.lt.s32.totalorder %s435_s15, %s435_s15 }
  0x3e   :  { %v69_v5 = vld [vmem:[#allocation2] sm:$0xff] }
  0x3f   :  { %p442_p13 = por %p441_p12, %p440_p11 }
  0x40   :  { %353 = vmatpush3.bf16.msra.mxu1 %v352_v40 }
  0x41   :  { %p443_p0 = pnand %p442_p13, %p436_p10 }
  0xc6   :  { %v72_v6 = vpop.xlane.xlu0 %71 }
  0xc7   :  { %v73_v7 = vadd.f32 %v72_v6, %v69_v5 }
  0xc9   :  { %75 = vst.msk [vmem:[#allocation2] sm:$0xff] %vm65_vm0, %v73_v7 }
  0xd0   :  { %v79_v8 = vld [vmem:[#allocation2] sm:$0xff] }
  0xd1   :  { %v83_v9 = vmul.f32 0.00390625, %v79_v8  ;;  %v81_v10 = vcombine.high %v79_v8, %v79_v8 }
  0xd3   :  { %96 = vperm.xlu0 %364, %v83_v9   ;;  %v84_v11 = vmul.f32 0.00390625, %v81_v10 }
  0xd5   :  { %99 = vperm.xlu1 %365, %v84_v11  }
 0x152   :  { %v97_v17 = vpop.permute.xlu0 %96 }
 0x153   :  { %v106_v19 = vrot.slane %v97_v17, %v105_v16 }
 0x154   :  { %v100_v18 = vpop.permute.xlu1 %99 }
 0x155   :  { %v110_v20 = vrot.slane %v100_v18, %v105_v16 }
 0x157   :  { %v112_v21 = vsel %vm111_vm3, %v110_v20, %v106_v19 }
 0x158   :  { %335 = vmatmul.mubr.msk.f32.vlgmr.msra.gmra.mrb[0].mxu0 %vm113_vm4, %v112_v21 }
 0x22b   :  { %v186_v23 = vpop.f32.mrb[0].mxu0 }
 0x22c   :  { %v187_v24 = vadd.f32 %v319_v22, %v186_v23  ;;  %v336_v25 = vpop.f32.mrb[1].mxu0 }
 0x22e   :  { %v191_v26 = vmul.f32 0.01, %v187_v24  ;;  %vm190_vm5 = vcmp.gt.f32.partialorder %v187_v24, 0.0 }
 0x230   :  { %v192_v27 = vsel %vm190_vm5, %v187_v24, %v191_v26 }
 0x231   :  { %v194_v28 = vsel %vm193_vm6, %v192_v27, 0.0 }
 0x232   :  { %195 = vadd.xlane.f32.xlu1 %v194_v28 }
 0x2bf   :  { %v196_v29 = vpop.xlane.xlu1 %195 }
 0x2c0   :  { %v198_v30 = vmul.f32 0.03125, %v196_v29 }
 0x2c2   :  { %v199_v31 = vsub.f32 %v192_v27, %v198_v30 }
 0x2c4   :  { %v200_v32 = vmul.f32 %v199_v31, %v199_v31 }
 0x2c6   :  { %v201_v33 = vsel %vm193_vm6, %v200_v32, 0.0 }
 0x2c7   :  { %202 = vadd.xlane.f32.xlu1 %v201_v33 }
 0x354   :  { %v203_v41 = vpop.xlane.xlu1 %202 }
 0x355   :  { %v204_v42 = vmul.f32 0.03125, %v203_v41 }
 0x357   :  { %v205_v43 = vadd.f32 1e-05, %v204_v42 }
 0x359   :  { %367 = vrsqrt.f32 %v205_v43 }
 0x363   :  { %v368_v44 = vpop.eup %367 }
 0x364   :  { %v207_v46 = vmul.f32 %v368_v44, %v199_v31 }
 0x366   :  { %v215_v48 = vmul.f32 %v322_v45, %v207_v46 }
 0x368   :  { %v223_v49 = vadd.f32 %v323_v47, %v215_v48 }
 0x36a   :  { %346 = vmatmul.mubr.msk.f32.vlgmr.msra.gmra.mrb[0].mxu1 %vm228_vm7, %v223_v49 }
 0x43d   :  { %v298_v50 = vpop.f32.mrb[0].mxu1 }
 0x43e   :  { %302 = vst.msk [vmem:[#allocation9] sm:$0x3] %vm193_vm6, %v298_v50  ;;  %v347_v51 = vpop.f32.mrb[1].mxu1 }
 0x43f   :  { %446 = shalt.err (!%p443_p0)
}
 0x440   :  { %s447_s16 = scalar_lea.hbm %s574_s6, 32 }
 0x441   :  { %p448_p1 = scmp.ne.s32.totalorder %s574_s6, %s447_s16  ;;  %p451_p2 = scmp.lt.u32.totalorder %s447_s16, %s574_s6 }
 0x443   :  { %p453_p3 = pnand %p451_p2, %p448_p1 }
 0x445   :  { %456 = shalt.err (!%p453_p3)
}
 0x446   :  { %312 = dma.vmem_to_hbm [thread:$0]  %s310_s14, 32, %s574_s6, [#allocation5]  }
 0x447   :  { %461 = dma.done.wait [#allocation5], 32  }
 0x448   :  { %462 = vsyncadd [#allocation5], 4294967264 }
 0x449   :  { %316 = vsyncpa [#allocation4], 1 }
 0x44a   :  { %317 = vsyncpa [#allocation7], 1 }
 0x44b   :  { %318 = vsyncpa [#allocation5], 1 }

</bundles_post_ra>
